<compile_context>
chip_gen: v7x
topology: tpu7x:2x2x1
jax: 0.10.0
libtpu: 0.0.40
codegen_flags: <defaults>
</compile_context>

<pallas_src>
import math
import functools

import jax
import jax.numpy as jnp
from jax.experimental import pallas as pl
from jax.experimental.pallas import tpu as pltpu


# --------------------------- fused forward kernel ----------------------------
def _mha_fused_kernel(x_ref, wqkv_ref, bqkv_ref, wproj_ref, bproj_ref, o_ref,
                      qkv_scr, merged_scr, *, num_heads, head_dim):
    """One (block_batch, N, E) slab of the batch per grid step.

    x_ref      : (Bblk, N, E)   f32 activations
    wqkv_ref   : (E, 3E)        bf16 fused qkv weight, columns = [q | k | v],
                                head-major inside each section
    bqkv_ref   : (1, 3E)        f32 fused qkv bias (same column order)
    wproj_ref  : (E, E)         bf16 projection weight, already transposed and
                                pre-scaled by 1/sqrt(E)
    bproj_ref  : (1, E)         f32 projection bias
    o_ref      : (Bblk, N, E)   f32 output
    qkv_scr    : (Bblk, N, 3E)  bf16 VMEM scratch (fused qkv result)
    merged_scr : (Bblk, N, E)   bf16 VMEM scratch (re-merged heads)
    """
    H, D = num_heads, head_dim
    Bblk, N, E = x_ref.shape
    rows = Bblk * N

    # ---- fused QKV linear: ONE lane-dense (rows, E) @ (E, 3E) MXU matmul ----
    x = x_ref[...].reshape(rows, E).astype(jnp.bfloat16)
    qkv = jnp.dot(x, wqkv_ref[...], preferred_element_type=jnp.float32)
    qkv = qkv + bqkv_ref[...]                               # f32 bias add (VPU)
    qkv_scr[...] = qkv.astype(jnp.bfloat16).reshape(Bblk, N, 3 * E)

    # ---- per-head attention (static unroll; H is small here) ----------------
    # TODO(synk): for large H move heads onto a grid axis / lax.fori_loop so the
    # (N, N) softmax temps don't blow vreg live ranges; add KV tiling (online
    # softmax) for long N on v7x (64 MiB VMEM).
    for h in range(H):
        qh = qkv_scr[:, :, h * D:(h + 1) * D]               # (Bblk, N, D) bf16
        kh = qkv_scr[:, :, E + h * D:E + (h + 1) * D]
        vh = qkv_scr[:, :, 2 * E + h * D:2 * E + (h + 1) * D]

        # energy = q @ k^T, contracting last dims directly (no k.T relayout).
        energy = jnp.einsum('bqd,bkd->bqk', qh, kh,
                            preferred_element_type=jnp.float32)  # (Bblk, N, N)

        # Reference semantics: plain softmax over keys; the 1/sqrt(E) scale is
        # applied AFTER the softmax (folded into wproj at prep time).
        m = jnp.max(energy, axis=-1, keepdims=True)
        e = jnp.exp(energy - m)
        inv = pl.reciprocal(jnp.sum(e, axis=-1, keepdims=True), approx=True)
        attn = (e * inv).astype(jnp.bfloat16)

        oh = jnp.einsum('bqk,bkd->bqd', attn, vh,
                        preferred_element_type=jnp.float32)      # (Bblk, N, D)
        # Head re-merge 'b h n d -> b n (h d)': store at column offset h*D.
        merged_scr[:, :, h * D:(h + 1) * D] = oh.astype(jnp.bfloat16)

    # ---- output projection: ONE (rows, E) @ (E, E) matmul --------------------
    merged = merged_scr[...].reshape(rows, E)
    out = jnp.dot(merged, wproj_ref[...], preferred_element_type=jnp.float32)
    out = out + bproj_ref[...]
    o_ref[...] = out.reshape(Bblk, N, E)


# ------------------- one-time parameter preparation (NOT jitted) -------------
def prepare_mha_params(w_qkv, b_qkv, w_proj, b_proj, num_heads):
    """Re-layout the PyTorch-style parameters ONCE (call at init time, outside
    the jitted forward -- previously this gather/transpose ran on every call)."""
    three_e, E = w_qkv.shape
    assert three_e == 3 * E
    H = num_heads
    D = E // H
    assert H * D == E

    # PyTorch rearrange 'b n (h d qkv) -> qkv b h n d': output feature index
    # j = h*3*D + d*3 + s (qkv innermost).  We want fused column
    # c = s*E + h*D + d to hold feature j, so the q/k/v sections and each
    # per-head slice become contiguous lane ranges inside the kernel.
    s = jnp.arange(3).reshape(3, 1, 1)
    h = jnp.arange(H).reshape(1, H, 1)
    d = jnp.arange(D).reshape(1, 1, D)
    perm = (h * (3 * D) + d * 3 + s).reshape(3 * E)          # ordered (s, h, d)

    wqkv_f = jnp.take(w_qkv, perm, axis=0).T                 # (E, 3E)
    bqkv_f = jnp.take(b_qkv, perm, axis=0).reshape(1, 3 * E)

    # Fold the reference's post-softmax 1/sqrt(E) scale into the projection:
    # (merged/sqrt(E)) @ Wp^T + b == merged @ (Wp^T/sqrt(E)) + b.
    wproj_f = w_proj.T / math.sqrt(E)                        # (E, E)
    bproj_f = b_proj.reshape(1, E)

    # bf16 operands for the MXU; biases stay f32 (added to f32 accumulators).
    return (wqkv_f.astype(jnp.bfloat16), bqkv_f.astype(jnp.float32),
            wproj_f.astype(jnp.bfloat16), bproj_f.astype(jnp.float32))


def _pick_block_batch(B, N, max_rows=512):
    """Largest divisor of B with block_batch*N <= max_rows, keeping >=2 grid
    steps when B >= 2 so both TensorCores (megacore / v7x) get work."""
    best = 1
    for bb in range(1, B + 1):
        if B % bb or bb * N > max_rows:
            continue
        if B >= 2 and B // bb < 2:
            continue
        best = bb
    return best


# -------------------------------- wrapper ------------------------------------
@functools.partial(jax.jit, static_argnames=("num_heads", "block_batch"))
def multi_head_attention(x, wqkv_f, bqkv_f, wproj_f, bproj_f, *, num_heads,
                         block_batch=1):
    """x: (B, N, E) f32.  Weights must already come from prepare_mha_params."""
    B, N, E = x.shape
    H = num_heads
    D = E // H
    assert B % block_batch == 0
    Bblk = block_batch

    kern = functools.partial(_mha_fused_kernel, num_heads=H, head_dim=D)
    return pl.pallas_call(
        kern,
        out_shape=jax.ShapeDtypeStruct((B, N, E), jnp.float32),
        grid=(B // Bblk,),
        in_specs=[
            pl.BlockSpec((Bblk, N, E), lambda b: (b, 0, 0)),
            # Constant block index -> weights stay resident across grid steps.
            pl.BlockSpec((E, 3 * E), lambda b: (0, 0)),
            pl.BlockSpec((1, 3 * E), lambda b: (0, 0)),
            pl.BlockSpec((E, E), lambda b: (0, 0)),
            pl.BlockSpec((1, E), lambda b: (0, 0)),
        ],
        out_specs=pl.BlockSpec((Bblk, N, E), lambda b: (b, 0, 0)),
        scratch_shapes=[
            pltpu.VMEM((Bblk, N, 3 * E), jnp.bfloat16),   # fused qkv result
            pltpu.VMEM((Bblk, N, E), jnp.bfloat16),       # merged heads
        ],
        compiler_params=pltpu.CompilerParams(
            dimension_semantics=("parallel",)),
    )(x, wqkv_f, bqkv_f, wproj_f, bproj_f)


# ----------------------------- reference (jnp) -------------------------------
def _reference(x, w_qkv, b_qkv, w_proj, b_proj, num_heads):
    B, N, E = x.shape
    H = num_heads
    D = E // H
    qkv = x @ w_qkv.T + b_qkv
    qkv = qkv.reshape(B, N, H, D, 3).transpose(4, 0, 2, 1, 3)
    q, k, v = qkv[0], qkv[1], qkv[2]
    energy = jnp.einsum("bhqd,bhkd->bhqk", q, k)
    attn = jax.nn.softmax(energy, axis=-1) / math.sqrt(E)
    out = jnp.einsum("bhal,bhlv->bhav", attn, v)
    out = out.transpose(0, 2, 1, 3).reshape(B, N, E)
    return out @ w_proj.T + b_proj


# ---------------------------------- main --------------------------------------
if __name__ == "__main__":
    B, N, E, H = 2, 8, 32, 4  # head_dim D = 8

    key = jax.random.PRNGKey(0)
    k1, k2, k3, k4, k5 = jax.random.split(key, 5)

    x = jax.random.normal(k1, (B, N, E), dtype=jnp.float32)

    # Deterministic PyTorch-Linear-style init: U(-1/sqrt(in), 1/sqrt(in)),
    # weights stored (out_features, in_features).
    bound = 1.0 / math.sqrt(E)
    w_qkv = jax.random.uniform(k2, (3 * E, E), jnp.float32, -bound, bound)
    b_qkv = jax.random.uniform(k3, (3 * E,), jnp.float32, -bound, bound)
    w_proj = jax.random.uniform(k4, (E, E), jnp.float32, -bound, bound)
    b_proj = jax.random.uniform(k5, (E,), jnp.float32, -bound, bound)

    # One-time parameter re-layout (outside the jitted forward).
    params = prepare_mha_params(w_qkv, b_qkv, w_proj, b_proj, H)
    params = jax.tree_util.tree_map(jax.block_until_ready, params)

    bb = _pick_block_batch(B, N)
    out = multi_head_attention(x, *params, num_heads=H, block_batch=bb)
    out = jax.block_until_ready(out)

    ref = _reference(x, w_qkv, b_qkv, w_proj, b_proj, H)
    assert out.shape == (B, N, E)
    # Tolerance accounts for bf16 MXU operands + approx EUP reciprocal.
    assert jnp.allclose(out, ref, atol=3e-2, rtol=3e-2), "mismatch vs reference"

    print("KERNEL_OK")
</pallas_src>

<mosaic_0001>
module attributes {stable_mosaic.version = 11 : i64} {
  func.func @_mha_fused_kernel(%arg0: i32, %arg1: memref<1x8x32xf32, #tpu.memory_space<vmem>>, %arg2: memref<32x96xbf16, #tpu.memory_space<vmem>>, %arg3: memref<1x96xf32, #tpu.memory_space<vmem>>, %arg4: memref<32x32xbf16, #tpu.memory_space<vmem>>, %arg5: memref<1x32xf32, #tpu.memory_space<vmem>>, %arg6: memref<1x8x32xf32, #tpu.memory_space<vmem>>, %arg7: memref<1x8x96xbf16, #tpu.memory_space<vmem>>, %arg8: memref<1x8x32xbf16, #tpu.memory_space<vmem>>) attributes {dimension_semantics = [#tpu.dimension_semantics<parallel>], iteration_bounds = array<i64: 2>, scalar_prefetch = 0 : i64, scratch_operands = 2 : i64, tpu.core_type = #tpu.core_type<tc>, window_params = [{transform_indices = @transform_0, window_bounds = array<i64: 1, 8, 32>}, {pipeline_mode = #tpu.pipeline_mode<synchronous>, transform_indices = @transform_1, window_bounds = array<i64: 32, 96>}, {pipeline_mode = #tpu.pipeline_mode<synchronous>, transform_indices = @transform_2, window_bounds = array<i64: 1, 96>}, {pipeline_mode = #tpu.pipeline_mode<synchronous>, transform_indices = @transform_3, window_bounds = array<i64: 32, 32>}, {pipeline_mode = #tpu.pipeline_mode<synchronous>, transform_indices = @transform_4, window_bounds = array<i64: 1, 32>}, {transform_indices = @transform_5, window_bounds = array<i64: 1, 8, 32>}]} {
    %c0 = arith.constant 0 : index
    %c0_0 = arith.constant 0 : index
    %c0_1 = arith.constant 0 : index
    %0 = vector.load %arg1[%c0, %c0_0, %c0_1] : memref<1x8x32xf32, #tpu.memory_space<vmem>>, vector<1x8x32xf32>
    %1 = vector.shape_cast %0 : vector<1x8x32xf32> to vector<8x32xf32>
    %2 = arith.truncf %1 : vector<8x32xf32> to vector<8x32xbf16>
    %c0_2 = arith.constant 0 : index
    %c0_3 = arith.constant 0 : index
    %3 = vector.load %arg2[%c0_2, %c0_3] : memref<32x96xbf16, #tpu.memory_space<vmem>>, vector<32x96xbf16>
    %cst = arith.constant dense<0.000000e+00> : vector<8x96xf32>
    %4 = tpu.matmul %2, %3, %cst {dimension_numbers = #tpu.dot_dimension_numbers<[1], [0], [0], [1], [0, 0, 1, 1], [], []>} : vector<8x32xbf16>, vector<32x96xbf16>, vector<8x96xf32> -> vector<8x96xf32>
    %c0_4 = arith.constant 0 : index
    %c0_5 = arith.constant 0 : index
    %5 = vector.load %arg3[%c0_4, %c0_5] : memref<1x96xf32, #tpu.memory_space<vmem>>, vector<1x96xf32>
    %6 = vector.broadcast %5 : vector<1x96xf32> to vector<8x96xf32>
    %7 = arith.addf %4, %6 : vector<8x96xf32>
    %8 = arith.truncf %7 : vector<8x96xf32> to vector<8x96xbf16>
    %9 = vector.shape_cast %8 : vector<8x96xbf16> to vector<1x8x96xbf16>
    %c0_6 = arith.constant 0 : index
    %c0_7 = arith.constant 0 : index
    %c0_8 = arith.constant 0 : index
    %10 = vector.load %arg7[%c0_6, %c0_7, %c0_8] : memref<1x8x96xbf16, #tpu.memory_space<vmem>>, vector<1x8x96xbf16>
    tpu.vector_store %arg7[%c0_6, %c0_7, %c0_8], %9 {strides = array<i32>} : memref<1x8x96xbf16, #tpu.memory_space<vmem>>, vector<1x8x96xbf16>,
    %c0_9 = arith.constant 0 : index
    %c0_10 = arith.constant 0 : index
    %c0_11 = arith.constant 0 : index
    %11 = vector.load %arg7[%c0_9, %c0_10, %c0_11] : memref<1x8x96xbf16, #tpu.memory_space<vmem>>, vector<1x8x8xbf16>
    %c0_12 = arith.constant 0 : index
    %c0_13 = arith.constant 0 : index
    %c32 = arith.constant 32 : index
    %12 = vector.load %arg7[%c0_12, %c0_13, %c32] : memref<1x8x96xbf16, #tpu.memory_space<vmem>>, vector<1x8x8xbf16>
    %c0_14 = arith.constant 0 : index
    %c0_15 = arith.constant 0 : index
    %c64 = arith.constant 64 : index
    %13 = vector.load %arg7[%c0_14, %c0_15, %c64] : memref<1x8x96xbf16, #tpu.memory_space<vmem>>, vector<1x8x8xbf16>
    "tpu.trace_start"() <{level = 10 : i32, message = "bqd,bkd->bqk"}> : () -> ()
    %cst_16 = arith.constant dense<0.000000e+00> : vector<1x8x8xf32>
    %14 = tpu.matmul %11, %12, %cst_16 {dimension_numbers = #tpu.dot_dimension_numbers<[2], [2], [1], [1], [0, 0, 0, 1, 1, 1], [0], [0]>} : vector<1x8x8xbf16>, vector<1x8x8xbf16>, vector<1x8x8xf32> -> vector<1x8x8xf32>
    "tpu.trace_stop"() : () -> ()
    %cst_17 = arith.constant dense<0xFF800000> : vector<1x8xf32>
    %15 = vector.multi_reduction <maximumf>, %14, %cst_17 [2] : vector<1x8x8xf32> to vector<1x8xf32>
    %16 = vector.shape_cast %15 : vector<1x8xf32> to vector<1x8x1xf32>
    %17 = vector.broadcast %16 : vector<1x8x1xf32> to vector<1x8x8xf32>
    %18 = arith.subf %14, %17 : vector<1x8x8xf32>
    %19 = math.exp %18 : vector<1x8x8xf32>
    %cst_18 = arith.constant dense<0.000000e+00> : vector<1x8xf32>
    %20 = vector.multi_reduction <add>, %19, %cst_18 [2] : vector<1x8x8xf32> to vector<1x8xf32>
    %21 = vector.shape_cast %20 : vector<1x8xf32> to vector<1x8x1xf32>
    %22 = tpu.reciprocal %21 {approx = true} : vector<1x8x1xf32> -> vector<1x8x1xf32>
    %23 = vector.broadcast %22 : vector<1x8x1xf32> to vector<1x8x8xf32>
    %24 = arith.mulf %19, %23 : vector<1x8x8xf32>
    %25 = arith.truncf %24 : vector<1x8x8xf32> to vector<1x8x8xbf16>
    "tpu.trace_start"() <{level = 10 : i32, message = "bqk,bkd->bqd"}> : () -> ()
    %cst_19 = arith.constant dense<0.000000e+00> : vector<1x8x8xf32>
    %26 = tpu.matmul %25, %13, %cst_19 {dimension_numbers = #tpu.dot_dimension_numbers<[2], [1], [1], [2], [0, 0, 0, 1, 1, 2], [0], [0]>} : vector<1x8x8xbf16>, vector<1x8x8xbf16>, vector<1x8x8xf32> -> vector<1x8x8xf32>
    "tpu.trace_stop"() : () -> ()
    %27 = arith.truncf %26 : vector<1x8x8xf32> to vector<1x8x8xbf16>
    %c0_20 = arith.constant 0 : index
    %c0_21 = arith.constant 0 : index
    %c0_22 = arith.constant 0 : index
    %28 = vector.load %arg8[%c0_20, %c0_21, %c0_22] : memref<1x8x32xbf16, #tpu.memory_space<vmem>>, vector<1x8x8xbf16>
    tpu.vector_store %arg8[%c0_20, %c0_21, %c0_22], %27 {strides = array<i32>} : memref<1x8x32xbf16, #tpu.memory_space<vmem>>, vector<1x8x8xbf16>,
    %c0_23 = arith.constant 0 : index
    %c0_24 = arith.constant 0 : index
    %c8 = arith.constant 8 : index
    %29 = vector.load %arg7[%c0_23, %c0_24, %c8] : memref<1x8x96xbf16, #tpu.memory_space<vmem>>, vector<1x8x8xbf16>
    %c0_25 = arith.constant 0 : index
    %c0_26 = arith.constant 0 : index
    %c40 = arith.constant 40 : index
    %30 = vector.load %arg7[%c0_25, %c0_26, %c40] : memref<1x8x96xbf16, #tpu.memory_space<vmem>>, vector<1x8x8xbf16>
    %c0_27 = arith.constant 0 : index
    %c0_28 = arith.constant 0 : index
    %c72 = arith.constant 72 : index
    %31 = vector.load %arg7[%c0_27, %c0_28, %c72] : memref<1x8x96xbf16, #tpu.memory_space<vmem>>, vector<1x8x8xbf16>
    "tpu.trace_start"() <{level = 10 : i32, message = "bqd,bkd->bqk"}> : () -> ()
    %cst_29 = arith.constant dense<0.000000e+00> : vector<1x8x8xf32>
    %32 = tpu.matmul %29, %30, %cst_29 {dimension_numbers = #tpu.dot_dimension_numbers<[2], [2], [1], [1], [0, 0, 0, 1, 1, 1], [0], [0]>} : vector<1x8x8xbf16>, vector<1x8x8xbf16>, vector<1x8x8xf32> -> vector<1x8x8xf32>
    "tpu.trace_stop"() : () -> ()
    %cst_30 = arith.constant dense<0xFF800000> : vector<1x8xf32>
    %33 = vector.multi_reduction <maximumf>, %32, %cst_30 [2] : vector<1x8x8xf32> to vector<1x8xf32>
    %34 = vector.shape_cast %33 : vector<1x8xf32> to vector<1x8x1xf32>
    %35 = vector.broadcast %34 : vector<1x8x1xf32> to vector<1x8x8xf32>
    %36 = arith.subf %32, %35 : vector<1x8x8xf32>
    %37 = math.exp %36 : vector<1x8x8xf32>
    %cst_31 = arith.constant dense<0.000000e+00> : vector<1x8xf32>
    %38 = vector.multi_reduction <add>, %37, %cst_31 [2] : vector<1x8x8xf32> to vector<1x8xf32>
    %39 = vector.shape_cast %38 : vector<1x8xf32> to vector<1x8x1xf32>
    %40 = tpu.reciprocal %39 {approx = true} : vector<1x8x1xf32> -> vector<1x8x1xf32>
    %41 = vector.broadcast %40 : vector<1x8x1xf32> to vector<1x8x8xf32>
    %42 = arith.mulf %37, %41 : vector<1x8x8xf32>
    %43 = arith.truncf %42 : vector<1x8x8xf32> to vector<1x8x8xbf16>
    "tpu.trace_start"() <{level = 10 : i32, message = "bqk,bkd->bqd"}> : () -> ()
    %cst_32 = arith.constant dense<0.000000e+00> : vector<1x8x8xf32>
    %44 = tpu.matmul %43, %31, %cst_32 {dimension_numbers = #tpu.dot_dimension_numbers<[2], [1], [1], [2], [0, 0, 0, 1, 1, 2], [0], [0]>} : vector<1x8x8xbf16>, vector<1x8x8xbf16>, vector<1x8x8xf32> -> vector<1x8x8xf32>
    "tpu.trace_stop"() : () -> ()
    %45 = arith.truncf %44 : vector<1x8x8xf32> to vector<1x8x8xbf16>
    %c0_33 = arith.constant 0 : index
    %c0_34 = arith.constant 0 : index
    %c8_35 = arith.constant 8 : index
    %46 = vector.load %arg8[%c0_33, %c0_34, %c8_35] : memref<1x8x32xbf16, #tpu.memory_space<vmem>>, vector<1x8x8xbf16>
    tpu.vector_store %arg8[%c0_33, %c0_34, %c8_35], %45 {strides = array<i32>} : memref<1x8x32xbf16, #tpu.memory_space<vmem>>, vector<1x8x8xbf16>,
    %c0_36 = arith.constant 0 : index
    %c0_37 = arith.constant 0 : index
    %c16 = arith.constant 16 : index
    %47 = vector.load %arg7[%c0_36, %c0_37, %c16] : memref<1x8x96xbf16, #tpu.memory_space<vmem>>, vector<1x8x8xbf16>
    %c0_38 = arith.constant 0 : index
    %c0_39 = arith.constant 0 : index
    %c48 = arith.constant 48 : index
    %48 = vector.load %arg7[%c0_38, %c0_39, %c48] : memref<1x8x96xbf16, #tpu.memory_space<vmem>>, vector<1x8x8xbf16>
    %c0_40 = arith.constant 0 : index
    %c0_41 = arith.constant 0 : index
    %c80 = arith.constant 80 : index
    %49 = vector.load %arg7[%c0_40, %c0_41, %c80] : memref<1x8x96xbf16, #tpu.memory_space<vmem>>, vector<1x8x8xbf16>
    "tpu.trace_start"() <{level = 10 : i32, message = "bqd,bkd->bqk"}> : () -> ()
    %cst_42 = arith.constant dense<0.000000e+00> : vector<1x8x8xf32>
    %50 = tpu.matmul %47, %48, %cst_42 {dimension_numbers = #tpu.dot_dimension_numbers<[2], [2], [1], [1], [0, 0, 0, 1, 1, 1], [0], [0]>} : vector<1x8x8xbf16>, vector<1x8x8xbf16>, vector<1x8x8xf32> -> vector<1x8x8xf32>
    "tpu.trace_stop"() : () -> ()
    %cst_43 = arith.constant dense<0xFF800000> : vector<1x8xf32>
    %51 = vector.multi_reduction <maximumf>, %50, %cst_43 [2] : vector<1x8x8xf32> to vector<1x8xf32>
    %52 = vector.shape_cast %51 : vector<1x8xf32> to vector<1x8x1xf32>
    %53 = vector.broadcast %52 : vector<1x8x1xf32> to vector<1x8x8xf32>
    %54 = arith.subf %50, %53 : vector<1x8x8xf32>
    %55 = math.exp %54 : vector<1x8x8xf32>
    %cst_44 = arith.constant dense<0.000000e+00> : vector<1x8xf32>
    %56 = vector.multi_reduction <add>, %55, %cst_44 [2] : vector<1x8x8xf32> to vector<1x8xf32>
    %57 = vector.shape_cast %56 : vector<1x8xf32> to vector<1x8x1xf32>
    %58 = tpu.reciprocal %57 {approx = true} : vector<1x8x1xf32> -> vector<1x8x1xf32>
    %59 = vector.broadcast %58 : vector<1x8x1xf32> to vector<1x8x8xf32>
    %60 = arith.mulf %55, %59 : vector<1x8x8xf32>
    %61 = arith.truncf %60 : vector<1x8x8xf32> to vector<1x8x8xbf16>
    "tpu.trace_start"() <{level = 10 : i32, message = "bqk,bkd->bqd"}> : () -> ()
    %cst_45 = arith.constant dense<0.000000e+00> : vector<1x8x8xf32>
    %62 = tpu.matmul %61, %49, %cst_45 {dimension_numbers = #tpu.dot_dimension_numbers<[2], [1], [1], [2], [0, 0, 0, 1, 1, 2], [0], [0]>} : vector<1x8x8xbf16>, vector<1x8x8xbf16>, vector<1x8x8xf32> -> vector<1x8x8xf32>
    "tpu.trace_stop"() : () -> ()
    %63 = arith.truncf %62 : vector<1x8x8xf32> to vector<1x8x8xbf16>
    %c0_46 = arith.constant 0 : index
    %c0_47 = arith.constant 0 : index
    %c16_48 = arith.constant 16 : index
    %64 = vector.load %arg8[%c0_46, %c0_47, %c16_48] : memref<1x8x32xbf16, #tpu.memory_space<vmem>>, vector<1x8x8xbf16>
    tpu.vector_store %arg8[%c0_46, %c0_47, %c16_48], %63 {strides = array<i32>} : memref<1x8x32xbf16, #tpu.memory_space<vmem>>, vector<1x8x8xbf16>,
    %c0_49 = arith.constant 0 : index
    %c0_50 = arith.constant 0 : index
    %c24 = arith.constant 24 : index
    %65 = vector.load %arg7[%c0_49, %c0_50, %c24] : memref<1x8x96xbf16, #tpu.memory_space<vmem>>, vector<1x8x8xbf16>
    %c0_51 = arith.constant 0 : index
    %c0_52 = arith.constant 0 : index
    %c56 = arith.constant 56 : index
    %66 = vector.load %arg7[%c0_51, %c0_52, %c56] : memref<1x8x96xbf16, #tpu.memory_space<vmem>>, vector<1x8x8xbf16>
    %c0_53 = arith.constant 0 : index
    %c0_54 = arith.constant 0 : index
    %c88 = arith.constant 88 : index
    %67 = vector.load %arg7[%c0_53, %c0_54, %c88] : memref<1x8x96xbf16, #tpu.memory_space<vmem>>, vector<1x8x8xbf16>
    "tpu.trace_start"() <{level = 10 : i32, message = "bqd,bkd->bqk"}> : () -> ()
    %cst_55 = arith.constant dense<0.000000e+00> : vector<1x8x8xf32>
    %68 = tpu.matmul %65, %66, %cst_55 {dimension_numbers = #tpu.dot_dimension_numbers<[2], [2], [1], [1], [0, 0, 0, 1, 1, 1], [0], [0]>} : vector<1x8x8xbf16>, vector<1x8x8xbf16>, vector<1x8x8xf32> -> vector<1x8x8xf32>
    "tpu.trace_stop"() : () -> ()
    %cst_56 = arith.constant dense<0xFF800000> : vector<1x8xf32>
    %69 = vector.multi_reduction <maximumf>, %68, %cst_56 [2] : vector<1x8x8xf32> to vector<1x8xf32>
    %70 = vector.shape_cast %69 : vector<1x8xf32> to vector<1x8x1xf32>
    %71 = vector.broadcast %70 : vector<1x8x1xf32> to vector<1x8x8xf32>
    %72 = arith.subf %68, %71 : vector<1x8x8xf32>
    %73 = math.exp %72 : vector<1x8x8xf32>
    %cst_57 = arith.constant dense<0.000000e+00> : vector<1x8xf32>
    %74 = vector.multi_reduction <add>, %73, %cst_57 [2] : vector<1x8x8xf32> to vector<1x8xf32>
    %75 = vector.shape_cast %74 : vector<1x8xf32> to vector<1x8x1xf32>
    %76 = tpu.reciprocal %75 {approx = true} : vector<1x8x1xf32> -> vector<1x8x1xf32>
    %77 = vector.broadcast %76 : vector<1x8x1xf32> to vector<1x8x8xf32>
    %78 = arith.mulf %73, %77 : vector<1x8x8xf32>
    %79 = arith.truncf %78 : vector<1x8x8xf32> to vector<1x8x8xbf16>
    "tpu.trace_start"() <{level = 10 : i32, message = "bqk,bkd->bqd"}> : () -> ()
    %cst_58 = arith.constant dense<0.000000e+00> : vector<1x8x8xf32>
    %80 = tpu.matmul %79, %67, %cst_58 {dimension_numbers = #tpu.dot_dimension_numbers<[2], [1], [1], [2], [0, 0, 0, 1, 1, 2], [0], [0]>} : vector<1x8x8xbf16>, vector<1x8x8xbf16>, vector<1x8x8xf32> -> vector<1x8x8xf32>
    "tpu.trace_stop"() : () -> ()
    %81 = arith.truncf %80 : vector<1x8x8xf32> to vector<1x8x8xbf16>
    %c0_59 = arith.constant 0 : index
    %c0_60 = arith.constant 0 : index
    %c24_61 = arith.constant 24 : index
    %82 = vector.load %arg8[%c0_59, %c0_60, %c24_61] : memref<1x8x32xbf16, #tpu.memory_space<vmem>>, vector<1x8x8xbf16>
    tpu.vector_store %arg8[%c0_59, %c0_60, %c24_61], %81 {strides = array<i32>} : memref<1x8x32xbf16, #tpu.memory_space<vmem>>, vector<1x8x8xbf16>,
    %c0_62 = arith.constant 0 : index
    %c0_63 = arith.constant 0 : index
    %c0_64 = arith.constant 0 : index
    %83 = vector.load %arg8[%c0_62, %c0_63, %c0_64] : memref<1x8x32xbf16, #tpu.memory_space<vmem>>, vector<1x8x32xbf16>
    %84 = vector.shape_cast %83 : vector<1x8x32xbf16> to vector<8x32xbf16>
    %c0_65 = arith.constant 0 : index
    %c0_66 = arith.constant 0 : index
    %85 = vector.load %arg4[%c0_65, %c0_66] : memref<32x32xbf16, #tpu.memory_space<vmem>>, vector<32x32xbf16>
    %cst_67 = arith.constant dense<0.000000e+00> : vector<8x32xf32>
    %86 = tpu.matmul %84, %85, %cst_67 {dimension_numbers = #tpu.dot_dimension_numbers<[1], [0], [0], [1], [0, 0, 1, 1], [], []>} : vector<8x32xbf16>, vector<32x32xbf16>, vector<8x32xf32> -> vector<8x32xf32>
    %c0_68 = arith.constant 0 : index
    %c0_69 = arith.constant 0 : index
    %87 = vector.load %arg5[%c0_68, %c0_69] : memref<1x32xf32, #tpu.memory_space<vmem>>, vector<1x32xf32>
    %88 = vector.broadcast %87 : vector<1x32xf32> to vector<8x32xf32>
    %89 = arith.addf %86, %88 : vector<8x32xf32>
    %90 = vector.shape_cast %89 : vector<8x32xf32> to vector<1x8x32xf32>
    %c0_70 = arith.constant 0 : index
    %c0_71 = arith.constant 0 : index
    %c0_72 = arith.constant 0 : index
    %91 = vector.load %arg6[%c0_70, %c0_71, %c0_72] : memref<1x8x32xf32, #tpu.memory_space<vmem>>, vector<1x8x32xf32>
    tpu.vector_store %arg6[%c0_70, %c0_71, %c0_72], %90 {strides = array<i32>} : memref<1x8x32xf32, #tpu.memory_space<vmem>>, vector<1x8x32xf32>,
    return
  }
  func.func @transform_0(%arg0: i32) -> (i32, i32, i32) {
    %c0_i32 = arith.constant 0 : i32
    %c0_i32_0 = arith.constant 0 : i32
    %c0_i32_1 = arith.constant 0 : i32
    return %arg0, %c0_i32, %c0_i32_0 : i32, i32, i32
  }
  func.func @transform_1(%arg0: i32) -> (i32, i32) {
    %c0_i32 = arith.constant 0 : i32
    %c0_i32_0 = arith.constant 0 : i32
    %c0_i32_1 = arith.constant 0 : i32
    return %c0_i32, %c0_i32_0 : i32, i32
  }
  func.func @transform_2(%arg0: i32) -> (i32, i32) {
    %c0_i32 = arith.constant 0 : i32
    %c0_i32_0 = arith.constant 0 : i32
    %c0_i32_1 = arith.constant 0 : i32
    return %c0_i32, %c0_i32_0 : i32, i32
  }
  func.func @transform_3(%arg0: i32) -> (i32, i32) {
    %c0_i32 = arith.constant 0 : i32
    %c0_i32_0 = arith.constant 0 : i32
    %c0_i32_1 = arith.constant 0 : i32
    return %c0_i32, %c0_i32_0 : i32, i32
  }
  func.func @transform_4(%arg0: i32) -> (i32, i32) {
    %c0_i32 = arith.constant 0 : i32
    %c0_i32_0 = arith.constant 0 : i32
    %c0_i32_1 = arith.constant 0 : i32
    return %c0_i32, %c0_i32_0 : i32, i32
  }
  func.func @transform_5(%arg0: i32) -> (i32, i32, i32) {
    %c0_i32 = arith.constant 0 : i32
    %c0_i32_0 = arith.constant 0 : i32
    %c0_i32_1 = arith.constant 0 : i32
    return %arg0, %c0_i32, %c0_i32_0 : i32, i32, i32
  }
}

</mosaic_0001>

<bundles_post_ra>
// kernel: multi_head_attention.1
= control target key start
LH: loop header
LB: loop body
LE: loop exit
PB: predicated region body
PF: predicated region fallthrough
CT: control target
= control target key end

     0   :  { %10 = vsyncpa [#allocation5], 0  ;;  %s1763_s0 = inlined_call_operand.hbm [shape: f32[2,8,32], index: 0, kind: input, shape index: {}]   ;;  %s1764_s1 = inlined_call_operand.hbm [shape: bf16[32,96], index: 1, kind: input, shape index: {}]   ;;  %s1765_s2 = inlined_call_operand.vmem [shape: f32[1,96], index: 2, kind: input, shape index: {}]   ;;  %s1766_s3 = inlined_call_operand.hbm [shape: bf16[32,32], index: 3, kind: input, shape index: {}]   ;;  %s1767_s4 = inlined_call_operand.vmem [shape: f32[1,32], index: 4, kind: input, shape index: {}]   ;;  %s1768_s5 = inlined_call_operand.hbm [shape: f32[2,8,32], index: 5, kind: output, shape index: {}]  }
   0x1   :  { %12 = vsyncpa [#allocation5 + $0x1], 0 }
   0x2   :  { %13 = vsyncpa [#allocation8], 0 }
   0x3   :  { %14 = vsyncpa [#allocation6], 0 }
   0x4   :  { %16 = vsyncpa [#allocation6 + $0x1], 0  ;;  %s1446_s18 = smov 0   ;;  %s1448_s19 = smov 0  }
   0x5   :  { %s1450_s20 = smov 0   ;;  %s1452_s21 = smov 0  }
   0x6 LB: > { %s1467_s22 = sadd.s32 4294967295, %s1392_s21   ;;  %s999_s23 = sadd.s32 4294967294, %s1392_s21   ;;  %s1392_s21 = sphi %s1452_s21, %s1788_s21   ;;  %s1388_s20 = sphi %s1450_s20, %s1787_s20   ;;  %s1384_s19 = sphi %s1448_s19, %s1786_s19   ;;  %s1380_s18 = sphi %s1446_s18, %s1785_s18  }
   0x7   : > { %p42_p0 = scmp.ne.s32.totalorder %s1384_s19, %s1380_s18  ;;  %p1769_p1 = scmp.eq.s32.totalorder %s1467_s22, 0 }
   0x8   : > { %p156_p3 = scmp.eq.s32.totalorder %s999_s23, 1  ;;  %p1000_p5 = scmp.ge.s32.totalorder %s1392_s21, 1 }
   0x9   : > { %p1476_p4 = por %p1769_p1, %p42_p0  ;;  %p163_p7 = scmp.lt.s32.totalorder %s1392_s21, 3 }
   0xa   : > { %p1481_p6 = por %p156_p3, %p42_p0  ;;  %s1394_s27 = smov [#allocation7]  }
   0xb   : > { %s1772_s24 = scalar_select %p1476_p4, 1, 0 }
   0xc   : > { %s1773_s25 = scalar_select %p1481_p6, 1, 0 }
   0xd   : > { %p1486_p8 = pnand %p1000_p5, %p163_p7  ;;  %s175_s28 = sshll.u32 %s1394_s27, 4  ;;  %s1490_s28 = int_to_ptr.vmem [resolvable:$true] %s175_s28 }
   0xe   : > { %s1395_s30 = smov [#allocation9]   ;;  %s1236_s9 = scalar_lea.hbm %s1764_s1, 256 }
   0xf   : > { %p1139_p9 = pneg %p1486_p8  ;;  %s191_s6 = sshll.u32 %s1395_s30, 4  ;;  %s1501_s6 = int_to_ptr.vmem [resolvable:$true] %s191_s6 }
  0x10   : > { %p1237_p12 = scmp.ne.s32.totalorder %s1764_s1, %s1236_s9  ;;  %p1243_p5 = scmp.lt.u32.totalorder %s1236_s9, %s1764_s1 }
  0x11   : > { %p1497_p11 = pnand %p1139_p9, %p1769_p1 }
  0x13   : > { %p1238_p13 = pneg %p1497_p11 }
  0x15   : > { %p1239_p0 = pnand %p1238_p13, %p1237_p12 }
  0x17   : > { %p1240_p3 = pneg %p1239_p0 }
  0x19   : > { %p1245_p7 = pnand %p1243_p5, %p1240_p3 }
  0x1b   : > { %1248 = shalt.err (!%p1245_p7)
}
  0x1c   : > { %s1249_s14 = scalar_lea.vmem %s1490_s28, 256  ;;  %p1257_p2 = scmp.lt.s32.totalorder %s1490_s28, %s1490_s28 }
  0x1d   : > { %p1250_p9 = scmp.ne.s32.totalorder %s1490_s28, %s1249_s14  ;;  %p1258_p12 = scmp.lt.s32.totalorder %s1249_s14, %s1249_s14 }
  0x1f   : > { %p1252_p10 = pnand %p1250_p9, %p1238_p13  ;;  %p1259_p0 = por %p1258_p12, %p1257_p2 }
  0x21   : > { %p1253_p1 = pneg %p1252_p10 }
  0x23   : > { %p1260_p6 = pnand %p1259_p0, %p1253_p1 }
  0x25   : > { %1263 = shalt.err (!%p1260_p6)
}
  0x26   : > { %s1396_s15 = smov 64   ;;  %s1397_s16 = smov 4  }
  0x27   : > { %1142 = dma.hbm_to_vmem [thread:$0]  (!%p1497_p11), %s1764_s1, 256, %s1490_s28, [#allocation8], %s1396_s15, %s1396_s15, %s1397_s16  }
  0x28   : > { %s1264_s7 = scalar_lea.hbm %s1766_s3, 256 }
  0x29   : > { %p1265_p2 = scmp.ne.s32.totalorder %s1766_s3, %s1264_s7  ;;  %p1271_p10 = scmp.lt.u32.totalorder %s1264_s7, %s1766_s3 }
  0x2b   : > { %p1267_p1 = pnand %p1265_p2, %p1238_p13 }
  0x2d   : > { %p1268_p6 = pneg %p1267_p1 }
  0x2f   : > { %p1273_p3 = pnand %p1271_p10, %p1268_p6 }
  0x31   : > { %1276 = shalt.err (!%p1273_p3)
}
  0x32   : > { %s1277_s28 = scalar_lea.vmem %s1501_s6, 256  ;;  %p1285_p12 = scmp.lt.s32.totalorder %s1501_s6, %s1501_s6 }
  0x33   : > { %p1278_p5 = scmp.ne.s32.totalorder %s1501_s6, %s1277_s28  ;;  %p1286_p0 = scmp.lt.s32.totalorder %s1277_s28, %s1277_s28 }
  0x35   : > { %p1280_p7 = pnand %p1278_p5, %p1238_p13  ;;  %p1287_p2 = por %p1286_p0, %p1285_p12 }
  0x37   : > { %p1281_p9 = pneg %p1280_p7 }
  0x39   : > { %p1288_p1 = pnand %p1287_p2, %p1281_p9 }
  0x3b   : > { %1291 = shalt.err (!%p1288_p1)
}
  0x3c   : > { %1145 = dma.hbm_to_vmem [thread:$0]  (!%p1497_p11), %s1766_s3, 256, %s1501_s6, [#allocation8], %s1396_s15, %s1396_s15, %s1397_s16  }
  0x3d   : > { %s1556_s14 = sadd.s32 1, %s1392_s21   ;;  %s29_s29 = sadd.s32 1, %s1388_s20 }
  0x3e   : > { %s26_s17 = ssub.s32 %s1392_s21, %s1556_s14  ;;  %p36_p13 = scmp.ne.s32.totalorder %s1388_s20, %s1384_s19 }
  0x3f   : > { %p27_p6 = scmp.eq.s32.totalorder %s26_s17, 0  ;;  %p37_p10 = scmp.eq.s32.totalorder %s1392_s21, 0 }
  0x40   : > { %p1776_p3 = scmp.eq.s32.totalorder %s1467_s22, 1  ;;  %p1156_p7 = scmp.lt.s32.totalorder %s1392_s21, 2 }
  0x41   : > { %s1572_s27 = scalar_select %p27_p6, %s1388_s20, %s29_s29  }
  0x42   : > { %p1566_p5 = por %p1776_p3, %p36_p13  ;;  %p38_p9 = por %p37_p10, %p36_p13 }
  0x43   : > { %s208_s30 = sand.u32 1, %s1388_s20   ;;  %s1005_s6 = sshll.u32 %s1392_s21, 7 }
  0x44   : > { %s1777_s23 = scalar_select %p1566_p5, 1, 0 }
  0x45   : > { %s1004_s7 = sshll.u32 %s208_s30, 3  ;;  %s1579_s8 = scalar_lea.hbm %s1763_s0, %s1005_s6 }
  0x46   : > { %s212_s9 = scalar_lea.vmem [#allocation4], %s1004_s7  ;;  %p1583_p11 = pnand %p1156_p7, %p38_p9 }
  0x47   : > { %s219_s10 = sshll.u32 %s212_s9, 4  ;;  %s209_s28 = scalar_lea.sflag [#allocation5], %s208_s30  ;;  %s1581_s10 = int_to_ptr.vmem [resolvable:$true] %s219_s10 }
  0x48   : > { %s1292_s12 = scalar_lea.hbm %s1579_s8, 128  ;;  %p1294_p0 = pneg %p1583_p11 }
  0x49   : > { %p1293_p12 = scmp.ne.s32.totalorder %s1579_s8, %s1292_s12  ;;  %s1297_s17 = scalar_lea.hbm %s1763_s0, 256 }
  0x4a   : > { %p1298_p13 = scmp.lt.u32.totalorder %s1579_s8, %s1763_s0  ;;  %p1299_p6 = scmp.lt.u32.totalorder %s1297_s17, %s1292_s12 }
  0x4b   : > { %p1295_p2 = pnand %p1294_p0, %p1293_p12  ;;  %p1301_p3 = scmp.lt.u32.totalorder %s1292_s12, %s1579_s8 }
  0x4c   : > { %p1300_p10 = por %p1299_p6, %p1298_p13 }
  0x4d   : > { %p1296_p1 = pneg %p1295_p2 }
  0x4e   : > { %p1302_p7 = por %p1301_p3, %p1300_p10 }
  0x50   : > { %p1303_p9 = pnand %p1302_p7, %p1296_p1 }
  0x52   : > { %1306 = shalt.err (!%p1303_p9)
}
  0x53   : > { %s1307_s30 = scalar_lea.vmem %s1581_s10, 128  ;;  %s1398_s15 = smov [#allocation4]  }
  0x54   : > { %p1308_p12 = scmp.ne.s32.totalorder %s1581_s10, %s1307_s30  ;;  %s1312_s16 = sshll.u32 %s1398_s15, 4  ;;  %s1313_s16 = int_to_ptr.vmem [resolvable:$false] %s1312_s16 }
  0x55   : > { %s1314_s9 = scalar_lea.vmem %s1313_s16, 256  ;;  %p1315_p4 = scmp.lt.s32.totalorder %s1581_s10, %s1313_s16 }
  0x56   : > { %p1310_p2 = pnand %p1308_p12, %p1294_p0  ;;  %p1316_p13 = scmp.lt.s32.totalorder %s1314_s9, %s1307_s30 }
  0x58   : > { %p1311_p5 = pneg %p1310_p2  ;;  %p1317_p6 = por %p1316_p13, %p1315_p4 }
  0x5a   : > { %p1318_p10 = pnand %p1317_p6, %p1311_p5 }
  0x5c   : > { %1321 = shalt.err (!%p1318_p10)
}
  0x5d   : > { %1149 = dma.hbm_to_vmem [thread:$0]  (!%p1583_p11), %s1579_s8, 128, %s1581_s10, %s209_s28  }
  0x5e   : > { %228 = sbr.rel (%p1486_p8) target bundleno = 1620 (0x654), region = 40  ;;  %s1615_s12 = sand.u32 (!%p1486_p8), 1, %s1384_s19  }
  0x5f   : > { %s1007_s13 = sshll.u32 (!%p1486_p8), %s1615_s12, 3  ;;  %s231_s29 = scalar_lea.sflag (!%p1486_p8), [#allocation5], %s1615_s12 }
  0x60   : > { %s234_s17 = scalar_lea.vmem (!%p1486_p8), [#allocation4], %s1007_s13  ;;  %p1779_p4 = scmp.ne.s32.totalorder (!%p1486_p8), %s1772_s24, 0 }
  0x65   : > { %1367 = dma.done.wait (%p1779_p4), %s231_s29, 128  }
  0x66   : > { %1369 = vsyncadd (%p1779_p4), %s231_s29, 4294967168  ;;  %p1780_p5 = scmp.eq.s32.totalorder %s1467_s22, 0 }
  0x68   : > { %1371 = dma.done.wait (%p1780_p5), [#allocation8], 512   ;;  %p1781_p8 = pmov %p1780_p5 }
  0x69   : > { %v1399_v0 = vmov 0.0   ;;  %vm1400_vm0 = vmmov 0   ;;  %v1212_v1 = vld [vmem:[#allocation7] sm:$0xff]   ;;  %v1213_v2 = vld [vmem:[#allocation7 + $0x8] sm:$0xff]   ;;  %v270_v3 = vld [vmem:[%s234_s17] sm:$0xff]  ;;  %vm295_vm1 = vcmask 261120  }
  0x6a   : > { %1373 = vsyncadd (%p1781_p8), [#allocation8], 4294966784  ;;  %1063 = vmatprep.subr.bf16.mxu0 %v1399_v0  ;;  %1067 = vmatprep.mubr.msk.bf16.mxu0 %vm1400_vm0, %v1399_v0  ;;  %v271_v4 = vpack.c.bf16 %v270_v3, %v270_v3  ;;  %v1011_v5 = vld [vmem:[%s1765_s2] ss:$0 sm:$0xff]  ;;  %vm340_vm2 = vcmask 781312   ;;  %s1401_s8 = smov 120  }
  0x6b   : > { %1071 = vmatprep.subr.bf16.mxu1 %v1399_v0  ;;  %1073 = vmatprep.mubr.msk.bf16.mxu1 %vm1400_vm0, %v1399_v0  ;;  %s1402_s10 = smov 96   ;;  %s1403_s11 = smov 80   ;;  %vm348_vm3 = vcmask 64512   ;;  %vm412_vm4 = vcmask 1043456   ;;  %vm457_vm5 = vcmask 60416   ;;  %vm580_vm6 = vcmask 126016  }
  0x6c   : > { %1064 = vmatpush3.bf16.msra.mxu0 %v1212_v1  ;;  %s1404_s28 = smov 88   ;;  %s1405_s7 = smov 72   ;;  %vm703_vm7 = vcmask 191616   ;;  %vm826_vm8 = vcmask 257216  }
  0x6d   : > { %1065 = vmatprep.subr.bf16.mxu0 %v1399_v0  ;;  %s1406_s6 = smov 112   ;;  %s1407_s30 = smov 104  }
  0x6e   : > { %s1408_s15 = smov 56   ;;  %s1409_s16 = smov 64  }
  0x6f   : > { %s1410_s9 = smov 40   ;;  %s1411_s29 = smov 48  }
  0x70   : > { %1066 = vmatpush3.bf16.msra.mxu0 %v1213_v2  ;;  %s1412_s17 = smov 8   ;;  %s1413_s24 = smov 16  }
  0x71   : > { %1077 = vmatprep.subr.bf16.mxu0 %v1399_v0  ;;  %s1414_s26 = smov 24   ;;  %p1782_p0 = scmp.ne.s32.totalorder %s1777_s23, 0 }
  0x73   : > { %1068 = vmatmul.mubr.msk.bf16.vlgmr.msra.gmra.mrb[0].mxu0 %vm295_vm1, %v271_v4 }
  0x74   : > { %1079 = vmatprep.mubr.msk.bf16.mxu0 %vm1400_vm0, %v1399_v0 }
 0x146   : > { %v333_v6 = vpop.f32.mrb[0].mxu0 }
 0x147   : > { %v334_v7 = vadd.f32 %v1011_v5, %v333_v6  ;;  %v1069_v8 = vpop.f32.mrb[1].mxu0 }
 0x148   : > { %v336_v9 = vpop.f32.mrb[2].mxu0 }
 0x149   : > { %v339_v10 = vpack.c.bf16 %v334_v7, %v334_v7  ;;  %v1070_v11 = vpop.f32.mrb[3].mxu0 }
 0x14b   : > { %341 = vst.msk [vmem:[#allocation2] sm:$0xf] %vm340_vm2, %v339_v10 }
 0x152   : > { %v1643_v12 = vld [vmem:[#allocation2] ss:$0 sps:$4 sm:$0xff]  }
 0x153   : > { %v342_v13 = vld [vmem:[#allocation2] sm:$0xf]  ;;  %463 = vrot.lane.b32.xlu1 %v1643_v12, %s1401_s8 }
 0x154   : > { %v1645_v14 = vcombine.low %v342_v13, %v342_v13  ;;  %v1649_v15 = vld [vmem:[#allocation2] ss:$0 sps:$4 sm:$0xff]  }
 0x155   : > { %v1653_v16 = vld [vmem:[#allocation2] ss:$0 sps:$4 sm:$0xff]  }
 0x156   : > { %346 = vrot.lane.b32.xlu0 %v1645_v14, %s1402_s10 }
 0x157   : > { %588 = vrot.lane.b32.xlu1 %v1649_v15, %s1403_s11  ;;  %s1035_s11 = sshll.u32 %s1467_s22, 7  ;;  %s897_s22 = scalar_lea.sflag [#allocation6], %s1615_s12 }
 0x15a   : > { %465 = vrot.lane.b32.xlu0 %v1643_v12, %s1404_s28  ;;  %s268_s28 = scalar_lea.vmem [#allocation10], %s1007_s13 }
 0x15b   : > { %711 = vrot.lane.b32.xlu1 %v1653_v16, %s1405_s7  ;;  %s910_s7 = sshll.u32 %s268_s28, 4  ;;  %s1720_s7 = int_to_ptr.vmem [resolvable:$true] %s910_s7 }
 0x15c   : > { %s1322_s13 = scalar_lea.vmem %s1720_s7, 128 }
 0x15d   : > { %p1323_p11 = scmp.ne.s32.totalorder %s1720_s7, %s1322_s13 }
 0x15e   : > { %586 = vrot.lane.b32.xlu0 %v1649_v15, %s1406_s6 }
 0x15f   : > { %p1324_p1 = pnand %p1323_p11, %p1782_p0 }
 0x161   : > { %p1325_p3 = pneg %p1324_p1 }
 0x162   : > { %709 = vrot.lane.b32.xlu0 %v1653_v16, %s1407_s30 }
 0x1c5   : > { %v464_v20 = vpop.permute.xlu1 %463 }
 0x1c8   : > { %v347_v17 = vpop.permute.xlu0 %346 }
 0x1c9   : > { %v353_v18 = vsel %vm348_vm3, %v347_v17, 0  ;;  %v589_v22 = vpop.permute.xlu1 %588 }
 0x1ca   : > { %1072 = vmatpush3.bf16.xpose.msra.mxu1 %v353_v18  ;;  %v594_v23 = vsel %vm348_vm3, %v589_v22, 0 }
 0x1cb   : > { %1083 = vmatprep.subr.bf16.mxu1 %v1399_v0 }
 0x1cc   : > { %v466_v19 = vpop.permute.xlu0 %465 }
 0x1cd   : > { %v471_v21 = vsel %vm348_vm3, %v466_v19, 0  ;;  %v712_v24 = vpop.permute.xlu1 %711 }
 0x1ce   : > { %v717_v26 = vsel %vm348_vm3, %v712_v24, 0 }
 0x1d0   : > { %v587_v25 = vpop.permute.xlu0 %586 }
 0x1d1   : > { %1074 = vmatmul.mubr.msk.bf16.vlgmr.msra.gmra.mrb[0].mxu1 %vm348_vm3, %v342_v13 }
 0x1d2   : > { %1084 = vmatpush3.bf16.xpose.msra.mxu1 %v471_v21  ;;  %1085 = vmatprep.mubr.msk.bf16.mxu1 %vm1400_vm0, %v1399_v0 }
 0x1d3   : > { %1095 = vmatprep.subr.bf16.mxu1 %v1399_v0 }
 0x1d4   : > { %v710_v27 = vpop.permute.xlu0 %709 }
 0x1d9   : > { %1086 = vmatmul.mubr.msk.bf16.vlgmr.msra.gmra.mrb[4].mxu1 %vm348_vm3, %v464_v20 }
 0x1da   : > { %1096 = vmatpush3.bf16.xpose.msra.mxu1 %v594_v23  ;;  %1097 = vmatprep.mubr.msk.bf16.mxu1 %vm1400_vm0, %v1399_v0 }
 0x1db   : > { %1107 = vmatprep.subr.bf16.mxu1 %v1399_v0 }
 0x1e1   : > { %1098 = vmatmul.mubr.msk.bf16.vlgmr.msra.gmra.mrb[8].mxu1 %vm348_vm3, %v587_v25 }
 0x1e2   : > { %1108 = vmatpush3.bf16.xpose.msra.mxu1 %v717_v26  ;;  %1109 = vmatprep.mubr.msk.bf16.mxu1 %vm1400_vm0, %v1399_v0 }
 0x1e3   : > { %1119 = vmatprep.subr.bf16.mxu1 %v1399_v0 }
 0x1e9   : > { %1110 = vmatmul.mubr.msk.bf16.vlgmr.msra.gmra.mrb[12].mxu1 %vm348_vm3, %v710_v27 }
 0x1ea   : > { %1123 = vmatprep.mubr.msk.bf16.mxu1 %vm1400_vm0, %v1399_v0 }
 0x2a4   : > { %v389_v28 = vpop.f32.mrb[0].mxu1 }
 0x2a5   : > { %v1075_v29 = vpop.f32.mrb[1].mxu1  ;;  %v395_v30 = vsel %vm348_vm3, %v389_v28, -inf }
 0x2a6   : > { %396 = vmax.xlane.f32.xlu1 %v395_v30  ;;  %v392_v31 = vpop.f32.mrb[2].mxu1 }
 0x2a7   : > { %v1076_v32 = vpop.f32.mrb[3].mxu1 }
 0x2ac   : > { %v507_v33 = vpop.f32.mrb[4].mxu1 }
 0x2ad   : > { %v1087_v34 = vpop.f32.mrb[5].mxu1  ;;  %v513_v35 = vsel %vm348_vm3, %v507_v33, -inf }
 0x2ae   : > { %514 = vmax.xlane.f32.xlu0 %v513_v35  ;;  %v510_v36 = vpop.f32.mrb[6].mxu1 }
 0x2af   : > { %v1088_v37 = vpop.f32.mrb[7].mxu1 }
 0x2b4   : > { %v630_v38 = vpop.f32.mrb[8].mxu1 }
 0x2b5   : > { %v1099_v39 = vpop.f32.mrb[9].mxu1  ;;  %v636_v40 = vsel %vm348_vm3, %v630_v38, -inf }
 0x2b6   : > { %637 = vmax.xlane.f32.xlu0 %v636_v40  ;;  %v633_v41 = vpop.f32.mrb[10].mxu1  ;;  %v1218_v39 = vld [vmem:[#allocation9] sm:$0xff]  }
 0x2b7   : > { %v1100_v42 = vpop.f32.mrb[11].mxu1  ;;  %1120 = vmatpush3.bf16.msra.mxu1 %v1218_v39  ;;  %v1219_v41 = vld [vmem:[#allocation9 + $0x8] sm:$0xff]  }
 0x2b8   : > { %1121 = vmatprep.subr.bf16.mxu1 %v1399_v0 }
 0x2bb   : > { %1122 = vmatpush3.bf16.msra.mxu1 %v1219_v41 }
 0x2bc   : > { %v753_v43 = vpop.f32.mrb[12].mxu1 }
 0x2bd   : > { %v1111_v44 = vpop.f32.mrb[13].mxu1  ;;  %v759_v45 = vsel %vm348_vm3, %v753_v43, -inf }
 0x2be   : > { %760 = vmax.xlane.f32.xlu1 %v759_v45  ;;  %v756_v46 = vpop.f32.mrb[14].mxu1 }
 0x2bf   : > { %v1112_v47 = vpop.f32.mrb[15].mxu1 }
 0x333   : > { %v397_v48 = vpop.xlane.xlu1 %396 }
 0x334   : > { %v398_v49 = vsub.f32 %v389_v28, %v397_v48 }
 0x336   : > { %v399_v50 = vmul.f32 1.442695, %v398_v49 }
 0x338   : > { %1220 = vpow2.f32 %v399_v50 }
 0x33b   : > { %v515_v51 = vpop.xlane.xlu0 %514 }
 0x33c   : > { %v516_v52 = vsub.f32 %v507_v33, %v515_v51 }
 0x33e   : > { %v517_v53 = vmul.f32 1.442695, %v516_v52 }
 0x340   : > { %1222 = vpow2.f32 %v517_v53 }
 0x342   : > { %v1221_v54 = vpop.eup %1220 }
 0x343   : > { %v638_v55 = vpop.xlane.xlu0 %637  ;;  %v401_v56 = vsel %vm348_vm3, %v1221_v54, 0.0 }
 0x344   : > { %v639_v57 = vsub.f32 %v630_v38, %v638_v55  ;;  %402 = vadd.xlane.f32.xlu0 %v401_v56 }
 0x346   : > { %v640_v58 = vmul.f32 1.442695, %v639_v57 }
 0x348   : > { %1224 = vpow2.f32 %v640_v58 }
 0x34a   : > { %v1223_v59 = vpop.eup %1222 }
 0x34b   : > { %v519_v60 = vsel %vm348_vm3, %v1223_v59, 0.0  ;;  %v761_v63 = vpop.xlane.xlu1 %760 }
 0x34c   : > { %520 = vadd.xlane.f32.xlu1 %v519_v60  ;;  %v762_v1 = vsub.f32 %v753_v43, %v761_v63 }
 0x34e   : > { %v763_v2 = vmul.f32 1.442695, %v762_v1 }
 0x350   : > { %1226 = vpow2.f32 %v763_v2 }
 0x352   : > { %v1225_v61 = vpop.eup %1224 }
 0x353   : > { %v642_v62 = vsel %vm348_vm3, %v1225_v61, 0.0 }
 0x354   : > { %643 = vadd.xlane.f32.xlu0 %v642_v62 }
 0x35a   : > { %v1227_v3 = vpop.eup %1226 }
 0x35b   : > { %v765_v4 = vsel %vm348_vm3, %v1227_v3, 0.0 }
 0x35d   : > { %525 = vrot.lane.b32.xlu1 %v1643_v12, %s1408_s15  ;;  %s1718_s15 = scalar_lea.hbm %s1768_s5, %s1035_s11 }
 0x36a   : > { %407 = vrot.lane.b32.xlu0 %v1645_v14, %s1409_s16  ;;  %s1415_s16 = smov [#allocation10]  }
 0x36e   : > { %771 = vrot.lane.b32.xlu0 %v1653_v16, %s1410_s9  ;;  %s1326_s9 = sshll.u32 %s1415_s16, 4  ;;  %s1327_s9 = int_to_ptr.vmem [resolvable:$false] %s1326_s9 }
 0x36f   : > { %p1329_p7 = scmp.lt.s32.totalorder %s1720_s7, %s1327_s9 }
 0x381   : > { %766 = vadd.xlane.f32.xlu1 %v765_v4 }
 0x392   : > { %648 = vrot.lane.b32.xlu1 %v1649_v15, %s1411_s29  ;;  %s1328_s29 = scalar_lea.vmem %s1327_s9, 256 }
 0x393   : > { %p1330_p9 = scmp.lt.s32.totalorder %s1328_s29, %s1322_s13 }
 0x395   : > { %p1331_p12 = por %p1330_p9, %p1329_p7 }
 0x397   : > { %p1332_p2 = pnand %p1331_p12, %p1325_p3 }
 0x3d1   : > { %v403_v5 = vpop.xlane.xlu0 %402 }
 0x3d2   : > { %1228 = vrcp.f32 %v403_v5 }
 0x3d9   : > { %v521_v6 = vpop.xlane.xlu1 %520 }
 0x3da   : > { %1230 = vrcp.f32 %v521_v6 }
 0x3dc   : > { %v1229_v7 = vpop.eup %1228 }
 0x3dd   : > { %v405_v9 = vmul.f32 %v1229_v7, %v1221_v54  ;;  %v526_v12 = vpop.permute.xlu1 %525  ;;  %v1030_v54 = vld [vmem:[%s1767_s4] ss:$0 sm:$0xff] }
 0x3de   : > { %v531_v16 = vsel %vm412_vm4, %v526_v12, 0 }
 0x3df   : > { %v406_v13 = vpack.c.bf16 %v405_v9, %v405_v9 }
 0x3e1   : > { %v644_v8 = vpop.xlane.xlu0 %643 }
 0x3e2   : > { %1232 = vrcp.f32 %v644_v8 }
 0x3e4   : > { %v1231_v14 = vpop.eup %1230 }
 0x3e5   : > { %v408_v10 = vpop.permute.xlu0 %407  ;;  %v523_v15 = vmul.f32 %v1231_v14, %v1223_v59 }
 0x3e6   : > { %v414_v11 = vsel %vm412_vm4, %v408_v10, 0 }
 0x3e7   : > { %1078 = vmatpush3.bf16.msra.mxu0 %v414_v11  ;;  %v524_v17 = vpack.c.bf16 %v523_v15, %v523_v15 }
 0x3e8   : > { %1089 = vmatprep.subr.bf16.mxu0 %v1399_v0 }
 0x3e9   : > { %v772_v23 = vpop.permute.xlu0 %771 }
 0x3ea   : > { %1080 = vmatmul.mubr.msk.bf16.vlgmr.msra.gmra.mrb[4].mxu0 %vm348_vm3, %v406_v13  ;;  %v777_v25 = vsel %vm412_vm4, %v772_v23, 0 }
 0x3eb   : > { %1090 = vmatpush3.bf16.msra.mxu0 %v531_v16  ;;  %1091 = vmatprep.mubr.msk.bf16.mxu0 %vm1400_vm0, %v1399_v0 }
 0x3ec   : > { %1101 = vmatprep.subr.bf16.mxu0 %v1399_v0  ;;  %v1233_v18 = vpop.eup %1232 }
 0x3ed   : > { %v646_v20 = vmul.f32 %v1233_v18, %v1225_v61 }
 0x3ef   : > { %v647_v24 = vpack.c.bf16 %v646_v20, %v646_v20 }
 0x3f2   : > { %1092 = vmatmul.mubr.msk.bf16.vlgmr.msra.gmra.mrb[8].mxu0 %vm348_vm3, %v524_v17 }
 0x3f3   : > { %1103 = vmatprep.mubr.msk.bf16.mxu0 %vm1400_vm0, %v1399_v0 }
 0x40e   : > { %v767_v19 = vpop.xlane.xlu1 %766 }
 0x40f   : > { %1234 = vrcp.f32 %v767_v19 }
 0x412   : > { %v649_v21 = vpop.permute.xlu1 %648 }
 0x413   : > { %v654_v22 = vsel %vm412_vm4, %v649_v21, 0 }
 0x414   : > { %1102 = vmatpush3.bf16.msra.mxu0 %v654_v22 }
 0x415   : > { %1113 = vmatprep.subr.bf16.mxu0 %v1399_v0 }
 0x417   : > { %1104 = vmatmul.mubr.msk.bf16.vlgmr.msra.gmra.mrb[12].mxu0 %vm348_vm3, %v647_v24 }
 0x418   : > { %1114 = vmatpush3.bf16.msra.mxu0 %v777_v25  ;;  %1115 = vmatprep.mubr.msk.bf16.mxu0 %vm1400_vm0, %v1399_v0 }
 0x419   : > { %v1235_v26 = vpop.eup %1234 }
 0x41a   : > { %v769_v27 = vmul.f32 %v1235_v26, %v1227_v3 }
 0x41c   : > { %v770_v28 = vpack.c.bf16 %v769_v27, %v769_v27 }
 0x41f   : > { %1116 = vmatmul.mubr.msk.bf16.vlgmr.msra.gmra.mrb[16].mxu0 %vm348_vm3, %v770_v28 }
 0x4bd   : > { %v450_v29 = vpop.f32.mrb[4].mxu0 }
 0x4be   : > { %v456_v30 = vpack.c.bf16 %v450_v29, %v450_v29  ;;  %v1081_v31 = vpop.f32.mrb[5].mxu0 }
 0x4bf   : > { %v453_v32 = vpop.f32.mrb[6].mxu0 }
 0x4c0   : > { %458 = vst.msk [vmem:[#allocation3] sm:$0xf] %vm457_vm5, %v456_v30  ;;  %v1082_v33 = vpop.f32.mrb[7].mxu0 }
 0x4c5   : > { %v567_v34 = vpop.f32.mrb[8].mxu0 }
 0x4c6   : > { %v1038_v35 = vpack.c.bf16 %v567_v34, %v567_v34  ;;  %v1093_v36 = vpop.f32.mrb[9].mxu0 }
 0x4c7   : > { %v570_v37 = vpop.f32.mrb[10].mxu0 }
 0x4c8   : > { %577 = vrot.lane.b32.xlu1 %v1038_v35, %s1412_s17  ;;  %v1094_v38 = vpop.f32.mrb[11].mxu0 }
 0x4ea   : > { %v690_v40 = vpop.f32.mrb[12].mxu0 }
 0x4eb   : > { %v1039_v42 = vpack.c.bf16 %v690_v40, %v690_v40  ;;  %v1105_v43 = vpop.f32.mrb[13].mxu0 }
 0x4ec   : > { %v693_v44 = vpop.f32.mrb[14].mxu0 }
 0x4ed   : > { %700 = vrot.lane.b32.xlu0 %v1039_v42, %s1413_s24  ;;  %v1106_v45 = vpop.f32.mrb[15].mxu0 }
 0x4f2   : > { %v813_v46 = vpop.f32.mrb[16].mxu0 }
 0x4f3   : > { %v1040_v47 = vpack.c.bf16 %v813_v46, %v813_v46  ;;  %v1117_v48 = vpop.f32.mrb[17].mxu0 }
 0x4f4   : > { %v816_v49 = vpop.f32.mrb[18].mxu0 }
 0x4f5   : > { %823 = vrot.lane.b32.xlu1 %v1040_v47, %s1414_s26  ;;  %v1118_v50 = vpop.f32.mrb[19].mxu0 }
 0x53a   : > { %v578_v51 = vpop.permute.xlu1 %577 }
 0x53b   : > { %581 = vst.msk [vmem:[#allocation3] sm:$0xf] %vm580_vm6, %v578_v51 }
 0x55f   : > { %v701_v52 = vpop.permute.xlu0 %700 }
 0x560   : > { %704 = vst.msk [vmem:[#allocation3] sm:$0xf] %vm703_vm7, %v701_v52 }
 0x567   : > { %v824_v0 = vpop.permute.xlu1 %823 }
 0x568   : > { %827 = vst.msk [vmem:[#allocation3] sm:$0xf] %vm826_vm8, %v824_v0 }
 0x56f   : > { %v828_v53 = vld [vmem:[#allocation3] sm:$0xf] }
 0x570   : > { %1124 = vmatmul.mubr.msk.bf16.vlgmr.msra.gmra.mrb[16].mxu1 %vm295_vm1, %v828_v53 }
 0x643   : > { %v889_v55 = vpop.f32.mrb[16].mxu1 }
 0x644   : > { %v890_v56 = vadd.f32 %v1030_v54, %v889_v55  ;;  %v1125_v57 = vpop.f32.mrb[17].mxu1 }
 0x645   : > { %v892_v58 = vpop.f32.mrb[18].mxu1 }
 0x646   : > { %v1126_v59 = vpop.f32.mrb[19].mxu1  ;;  %895 = vst.msk [vmem:[%s268_s28] sm:$0xff] %vm295_vm1, %v890_v56 }
 0x647   : > { %1335 = shalt.err (!%p1332_p2)
}
 0x648   : > { %s1336_s12 = scalar_lea.hbm %s1718_s15, 128  ;;  %s1340_s26 = scalar_lea.hbm %s1768_s5, 256 }
 0x649   : > { %p1337_p13 = scmp.ne.s32.totalorder %s1718_s15, %s1336_s12  ;;  %p1341_p4 = scmp.lt.u32.totalorder %s1718_s15, %s1768_s5 }
 0x64a   : > { %p1342_p5 = scmp.lt.u32.totalorder %s1340_s26, %s1336_s12  ;;  %p1344_p11 = scmp.lt.u32.totalorder %s1336_s12, %s1718_s15 }
 0x64b   : > { %p1338_p6 = pnand %p1337_p13, %p1782_p0 }
 0x64c   : > { %p1343_p8 = por %p1342_p5, %p1341_p4 }
 0x64d   : > { %p1339_p10 = pneg %p1338_p6 }
 0x64e   : > { %p1345_p1 = por %p1344_p11, %p1343_p8 }
 0x650   : > { %p1346_p3 = pnand %p1345_p1, %p1339_p10 }
 0x652   : > { %1349 = shalt.err (!%p1346_p3)
}
 0x653   : > { %1137 = dma.vmem_to_hbm [thread:$0]  (%p1782_p0), %s1720_s7, 128, %s1718_s15, %s897_s22  }
 0x654 PF: > { %s922_s11 = sand.u32 1, %s1380_s18   ;;  %p1783_p7 = scmp.ne.s32.totalorder %s1773_s25, 0 }
 0x655   : > { %p1784_p9 = scmp.ge.s32.totalorder %s1392_s21, 2  ;;  %s923_s28 = scalar_lea.sflag [#allocation6], %s922_s11 }
 0x657   : > { %p1151_p12 = pnand %p1784_p9, %p1783_p7 }
 0x659   : > { %1375 = dma.done.wait (!%p1151_p12), %s923_s28, 128  }
 0x65a   : > { %1377 = vsyncadd (!%p1151_p12), %s923_s28, 4294967168  ;;  %p19_p2 = scmp.ge.s32.totalorder %s1556_s14, 4   ;;  %s1785_s18 = smov %s1384_s19 }
 0x65b   : > { %s1786_s19 = smov %s1388_s20  ;;  %s1787_s20 = smov %s1572_s27 }
 0x65c   : > { %s1788_s21 = smov %s1556_s14  ;;  %21 = sbr.rel (!%p19_p2) target bundleno = 6 (0x6), region = 93 }
 0x663   :  { %928 = vsyncpa [#allocation5], 1 }
 0x664   :  { %930 = vsyncpa [#allocation5 + $0x1], 1 }
 0x665   :  { %931 = vsyncpa [#allocation8], 1 }
 0x666   :  { %932 = vsyncpa [#allocation6], 1 }
 0x667   :  { %934 = vsyncpa [#allocation6 + $0x1], 1 }

</bundles_post_ra>
